<compile_context>
chip_gen: v6e
topology: v6e:2x2x1
jax: 0.10.0
libtpu: 0.0.40
codegen_flags: <defaults>
</compile_context>

<pallas_src>
import functools

import jax
import jax.numpy as jnp
from jax.experimental import pallas as pl
from jax.experimental.pallas import tpu as pltpu


def _scale_kernel(scale_ref, x_ref, o_ref):
    # scale_ref: SMEM (1,) f32 holding the folded a*b.
    scale = scale_ref[0]
    o_ref[...] = (x_ref[...].astype(jnp.float32) * scale).astype(o_ref.dtype)


@functools.partial(jax.jit, static_argnames=("target_tile_bytes",))
def linear_model_forward(x, a, b, *, target_tile_bytes=2 * 1024 * 1024):
    """y = a * b * x  (elementwise scale by two scalar parameters)."""
    orig_shape = x.shape
    orig_dtype = x.dtype
    lanes = 128
    n = x.size

    # Flatten; pad (once) only if numel is not already a multiple of 128.
    flat = x.reshape(-1)
    pad = (-n) % lanes
    if pad:
        flat = jnp.pad(flat, (0, pad))
    rows = flat.shape[0] // lanes
    x2d = flat.reshape(rows, lanes)

    # ~2 MiB per buffer, multiple of 8 sublanes; clamp to full extent for
    # small inputs (block == full array dim is always legal).  Large inputs
    # still give many grid steps so both v7x TensorCores stream in parallel.
    itemsize = jnp.dtype(orig_dtype).itemsize
    tile_rows = max(8, (target_tile_bytes // (lanes * itemsize)) // 8 * 8)
    if tile_rows >= rows:
        tile_rows = rows  # single block spanning the full array
    grid = (pl.cdiv(rows, tile_rows),)

    # Fold a*b into one prefetched scalar (matches torch's (a*b)*x order).
    scale = (jnp.asarray(a, jnp.float32) * jnp.asarray(b, jnp.float32)).reshape(1)

    out2d = pl.pallas_call(
        _scale_kernel,
        out_shape=jax.ShapeDtypeStruct((rows, lanes), orig_dtype),
        grid_spec=pltpu.PrefetchScalarGridSpec(
            num_scalar_prefetch=1,  # `scale` lands in SMEM
            grid=grid,
            in_specs=[
                pl.BlockSpec((tile_rows, lanes), lambda i, s: (i, 0)),
            ],
            out_specs=pl.BlockSpec((tile_rows, lanes), lambda i, s: (i, 0)),
        ),
        compiler_params=pltpu.CompilerParams(
            dimension_semantics=("parallel",),
        ),
        # x2d (input index 1; index 0 is the prefetched scalar) is a throwaway
        # reshaped copy -> reuse its HBM buffer for the output.
        input_output_aliases={1: 0},
    )(scale, x2d)

    out_flat = out2d.reshape(-1)
    if pad:
        out_flat = out_flat[:n]
    return out_flat.reshape(orig_shape)


if __name__ == "__main__":
    key = jax.random.PRNGKey(0)

    # Deterministic parameters matching LinearModel.__init__
    a = jnp.float32(4.0)
    b = jnp.float32(1.0)

    # Example input (NCHW-like small shape): 2048 elems = 16 x 128
    x = jax.random.normal(key, (2, 4, 16, 16), dtype=jnp.float32)

    y = linear_model_forward(x, a, b)
    y = jax.block_until_ready(y)

    y_ref = a * b * x
    assert y.shape == x.shape and y.dtype == x.dtype
    assert jnp.allclose(y, y_ref, atol=1e-6, rtol=1e-6)

    # Secondary check: ragged size (exercises the single-pad path).
    x2 = jax.random.normal(jax.random.PRNGKey(1), (3, 5, 7), dtype=jnp.float32)
    y2 = jax.block_until_ready(linear_model_forward(x2, a, b))
    assert jnp.allclose(y2, a * b * x2, atol=1e-6, rtol=1e-6)

    print("KERNEL_OK")
</pallas_src>

<mosaic_0001>
module attributes {stable_mosaic.version = 11 : i64} {
  func.func @_scale_kernel(%arg0: i32, %arg1: memref<1xf32, #tpu.memory_space<smem>>, %arg2: memref<16x128xf32, #tpu.memory_space<vmem>>, %arg3: memref<16x128xf32, #tpu.memory_space<vmem>>) attributes {dimension_semantics = [#tpu.dimension_semantics<parallel>], iteration_bounds = array<i64: 1>, scalar_prefetch = 1 : i64, scratch_operands = 0 : i64, tpu.core_type = #tpu.core_type<tc>, window_params = [{transform_indices = @transform_0, window_bounds = array<i64: 16, 128>}, {transform_indices = @transform_1, window_bounds = array<i64: 16, 128>}]} {
    %c0 = arith.constant 0 : index
    %0 = memref.load %arg1[%c0] : memref<1xf32, #tpu.memory_space<smem>>
    %c0_0 = arith.constant 0 : index
    %c0_1 = arith.constant 0 : index
    %1 = vector.load %arg2[%c0_0, %c0_1] : memref<16x128xf32, #tpu.memory_space<vmem>>, vector<16x128xf32>
    %2 = vector.broadcast %0 : f32 to vector<16x128xf32>
    %3 = arith.mulf %1, %2 : vector<16x128xf32>
    %c0_2 = arith.constant 0 : index
    %c0_3 = arith.constant 0 : index
    %4 = vector.load %arg3[%c0_2, %c0_3] : memref<16x128xf32, #tpu.memory_space<vmem>>, vector<16x128xf32>
    tpu.vector_store %arg3[%c0_2, %c0_3], %3 {strides = array<i32>} : memref<16x128xf32, #tpu.memory_space<vmem>>, vector<16x128xf32>,
    return
  }
  func.func @transform_0(%arg0: i32, %arg1: memref<1xf32, #tpu.memory_space<smem>>) -> (i32, i32) {
    %c0_i32 = arith.constant 0 : i32
    %c0_i32_0 = arith.constant 0 : i32
    return %arg0, %c0_i32 : i32, i32
  }
  func.func @transform_1(%arg0: i32, %arg1: memref<1xf32, #tpu.memory_space<smem>>) -> (i32, i32) {
    %c0_i32 = arith.constant 0 : i32
    %c0_i32_0 = arith.constant 0 : i32
    return %arg0, %c0_i32 : i32, i32
  }
}

</mosaic_0001>

<bundles_post_ra>
// kernel: linear_model_forward.1
= control target key start
LH: loop header
LB: loop body
LE: loop exit
PB: predicated region body
PF: predicated region fallthrough
CT: control target
= control target key end

     0   :  { %s52_s0 = inlined_call_operand.<no memory space> [shape: f32[1], index: 0, kind: input, shape index: {}]   ;;  %s53_s1 = inlined_call_operand.vmem [shape: f32[16,128], index: 1, kind: input, shape index: {}, may-alias: {1,2}]   ;;  %s54_s2 = inlined_call_operand.vmem [shape: f32[16,128], index: 2, kind: output, shape index: {}, may-alias: {1,2}]  }
   0x1   :  { %v11_v0 = vld [vmem:[%s53_s1] sm:$0xff]  ;;  %v13_v1 = vstv %s52_s0  ;;  %v12_v2 = vld [vmem:[%s53_s1 + $0x8] sm:$0xff] }
   0x2   :  { %v14_v3 = vmul.f32 %v13_v1, %v11_v0  ;;  %v15_v4 = vmul.f32 %v13_v1, %v12_v2 }
   0x4   :  { %16 = vst [vmem:[%s54_s2] sm:$0xff] %v14_v3  ;;  %17 = vst [vmem:[%s54_s2 + $0x8] sm:$0xff] %v15_v4 }

</bundles_post_ra>
